<compile_context>
chip_gen: v6e
topology: v6e:2x2x1
jax: 0.10.0
libtpu: 0.0.40
codegen_flags: <defaults>
</compile_context>

<pallas_src>
import jax
import jax.numpy as jnp
from jax.experimental import pallas as pl
from jax.experimental.pallas import tpu as pltpu


def _round_up(x: int, m: int) -> int:
    return ((x + m - 1) // m) * m


# ---------------------------------------------------------------------------
# Pallas kernel: generic tanh-RNN recurrence over one (time_chunk, batch_tile)
# block.  preact already contains x @ W_ih + b for every timestep.
# ---------------------------------------------------------------------------
def rnn_recurrence_kernel(preact_ref,    # (TC, TB, Hp)  hoisted input projection
                          whh_ref,       # (Hp, Hp)      W_hh^T (zero-padded)
                          hseq_ref,      # (TC, TB, Hp)  output hidden states
                          hcarry_ref):   # (TB, Hp)      VMEM carry across chunks
    # h_0 = 0 (PyTorch default) at the first time chunk of each batch tile.
    @pl.when(pl.program_id(1) == 0)
    def _():
        hcarry_ref[...] = jnp.zeros_like(hcarry_ref)

    tc = preact_ref.shape[0]

    def step(i, h):
        h_new = jnp.tanh(
            preact_ref[i]
            + jnp.dot(h, whh_ref[...], preferred_element_type=jnp.float32))
        hseq_ref[i] = h_new
        return h_new

    hcarry_ref[...] = jax.lax.fori_loop(0, tc, step, hcarry_ref[...],
                                        unroll=True)


def run_rnn_recurrence(preact, whh_T, *, time_chunk, batch_tile):
    """preact: (S, Bp, Hp) f32; whh_T: (Hp, Hp) f32 -> h sequence (S, Bp, Hp)."""
    S, Bp, Hp = preact.shape
    assert S % time_chunk == 0 and Bp % batch_tile == 0

    grid = (Bp // batch_tile, S // time_chunk)   # batch parallel, time sequential
    return pl.pallas_call(
        rnn_recurrence_kernel,
        out_shape=jax.ShapeDtypeStruct((S, Bp, Hp), jnp.float32),
        grid_spec=pltpu.PrefetchScalarGridSpec(
            num_scalar_prefetch=0,
            grid=grid,
            in_specs=[
                pl.BlockSpec((time_chunk, batch_tile, Hp),
                             lambda b, t: (t, b, 0)),
                pl.BlockSpec((Hp, Hp), lambda b, t: (0, 0)),   # constant weight
            ],
            out_specs=pl.BlockSpec((time_chunk, batch_tile, Hp),
                                   lambda b, t: (t, b, 0)),
            scratch_shapes=[pltpu.VMEM((batch_tile, Hp), jnp.float32)],
        ),
        compiler_params=pltpu.CompilerParams(
            dimension_semantics=("parallel", "arbitrary"),
            vmem_limit_bytes=32 * 1024 * 1024,
        ),
    )(preact, whh_T)


# ---------------------------------------------------------------------------
# Full RNNModel.forward
# ---------------------------------------------------------------------------
def rnn_model_forward(x_ids, params, *, time_chunk=None, batch_tile=None):
    """x_ids: (B, S) int32 -> (B, S, O) f32 (matches batch_first PyTorch)."""
    emb_table = params["embedding"]                  # (V, E)
    B, S = x_ids.shape
    H = params["whh1_T"].shape[0]
    O = params["wfc_T"].shape[1]

    Hp = _round_up(H, 128)                           # lane-dense hidden
    Bp = _round_up(B, 8)                             # sublane-dense batch

    tc = time_chunk if time_chunk is not None else S
    tb = batch_tile if batch_tile is not None else Bp

    # Embedding lookup (plain JAX gather — glue around the kernel).
    emb = jnp.take(emb_table, x_ids, axis=0)         # (B, S, E)
    emb_tm = jnp.transpose(emb, (1, 0, 2))           # (S, B, E) time-major
    emb_tm = jnp.pad(emb_tm, ((0, 0), (0, Bp - B), (0, 0)))

    # Zero-pad the recurrent weights to Hp x Hp (padded lanes stay zero).
    whh1_p = jnp.pad(params["whh1_T"], ((0, Hp - H), (0, Hp - H)))
    whh2_p = jnp.pad(params["whh2_T"], ((0, Hp - H), (0, Hp - H)))

    # Hoisted layer-1 input projection: one (S*Bp, E) @ (E, H) matmul + bias.
    pre1 = emb_tm @ params["wih1_T"] + params["b1"]          # (S, Bp, H)
    pre1 = jnp.pad(pre1, ((0, 0), (0, 0), (0, Hp - H)))

    h1_seq = run_rnn_recurrence(pre1, whh1_p,
                                time_chunk=tc, batch_tile=tb)  # (S, Bp, Hp)

    # Hoisted inter-layer projection: one (S*Bp, H) @ (H, H) matmul + bias.
    pre2 = h1_seq[:, :, :H] @ params["wih2_T"] + params["b2"]  # (S, Bp, H)
    pre2 = jnp.pad(pre2, ((0, 0), (0, 0), (0, Hp - H)))

    h2_seq = run_rnn_recurrence(pre2, whh2_p,
                                time_chunk=tc, batch_tile=tb)  # (S, Bp, Hp)

    # Hoisted fc head: one (S*Bp, H) @ (H, O) matmul + bias.
    out_tm = h2_seq[:, :, :H] @ params["wfc_T"] + params["bfc"]  # (S, Bp, O)

    # Drop batch padding, back to batch_first.
    return jnp.transpose(out_tm[:, :B, :], (1, 0, 2))            # (B, S, O)


# ---------------------------------------------------------------------------
# Parameters / reference
# ---------------------------------------------------------------------------
def init_params(key, vocab_size, embedding_dim, hidden_dim, output_dim):
    """Deterministic synthetic parameters mirroring the nn.Module shapes."""
    ks = jax.random.split(key, 12)
    u = lambda k, shape, bound: jax.random.uniform(
        k, shape, jnp.float32, minval=-bound, maxval=bound)

    emb = jax.random.normal(ks[0], (vocab_size, embedding_dim), jnp.float32)
    emb = emb.at[0].set(0.0)                       # padding_idx=0 row is zero

    bh = 1.0 / jnp.sqrt(hidden_dim)
    wih1 = u(ks[1], (hidden_dim, embedding_dim), bh)
    whh1 = u(ks[2], (hidden_dim, hidden_dim), bh)
    bih1 = u(ks[3], (hidden_dim,), bh)
    bhh1 = u(ks[4], (hidden_dim,), bh)
    wih2 = u(ks[5], (hidden_dim, hidden_dim), bh)
    whh2 = u(ks[6], (hidden_dim, hidden_dim), bh)
    bih2 = u(ks[7], (hidden_dim,), bh)
    bhh2 = u(ks[8], (hidden_dim,), bh)
    wfc = u(ks[9], (output_dim, hidden_dim), bh)
    bfc = u(ks[10], (output_dim,), bh)

    return {
        "embedding": emb,
        "wih1_T": wih1.T, "whh1_T": whh1.T, "b1": (bih1 + bhh1)[None, :],
        "wih2_T": wih2.T, "whh2_T": whh2.T, "b2": (bih2 + bhh2)[None, :],
        "wfc_T": wfc.T, "bfc": bfc[None, :],
    }


def reference_forward(x_ids, params):
    """Pure-JAX reference of the same forward pass (lax.scan recurrence)."""
    emb = jnp.take(params["embedding"], x_ids, axis=0)       # (B, S, E)
    B = emb.shape[0]
    H = params["wih1_T"].shape[1]

    def layer(x_tm, wih_T, whh_T, b):
        def step(h, x_t):
            h_new = jnp.tanh(x_t @ wih_T + h @ whh_T + b)
            return h_new, h_new
        h0 = jnp.zeros((B, H), jnp.float32)
        _, ys = jax.lax.scan(step, h0, x_tm)
        return ys

    x_tm = jnp.transpose(emb, (1, 0, 2))                     # (S, B, E)
    h1 = layer(x_tm, params["wih1_T"], params["whh1_T"], params["b1"])
    h2 = layer(h1, params["wih2_T"], params["whh2_T"], params["b2"])
    out_tm = h2 @ params["wfc_T"] + params["bfc"]
    return jnp.transpose(out_tm, (1, 0, 2))                  # (B, S, O)


if __name__ == "__main__":
    vocab_size = 20
    embedding_dim = 16
    hidden_dim = 32
    output_dim = 20
    batch = 2
    seq_len = 8

    key = jax.random.PRNGKey(0)
    kp, kx = jax.random.split(key)
    params = init_params(kp, vocab_size, embedding_dim, hidden_dim, output_dim)
    x_ids = jax.random.randint(kx, (batch, seq_len), 0, vocab_size,
                               dtype=jnp.int32)

    fwd = jax.jit(rnn_model_forward)
    out = jax.block_until_ready(fwd(x_ids, params))

    ref = jax.block_until_ready(reference_forward(x_ids, params))
    assert out.shape == (batch, seq_len, output_dim)
    assert jnp.allclose(out, ref, atol=1e-5, rtol=1e-5)

    print("KERNEL_OK")
</pallas_src>

<mosaic_0001>
module attributes {stable_mosaic.version = 11 : i64} {
  func.func @rnn_recurrence_kernel(%arg0: i32, %arg1: i32, %arg2: memref<8x8x128xf32, #tpu.memory_space<vmem>>, %arg3: memref<128x128xf32, #tpu.memory_space<vmem>>, %arg4: memref<8x8x128xf32, #tpu.memory_space<vmem>>, %arg5: memref<8x128xf32, #tpu.memory_space<vmem>>) attributes {dimension_semantics = [#tpu.dimension_semantics<parallel>, #tpu.dimension_semantics<arbitrary>], iteration_bounds = array<i64: 1, 1>, scalar_prefetch = 0 : i64, scratch_operands = 1 : i64, tpu.core_type = #tpu.core_type<tc>, window_params = [{transform_indices = @transform_0, window_bounds = array<i64: 8, 8, 128>}, {pipeline_mode = #tpu.pipeline_mode<synchronous>, transform_indices = @transform_1, window_bounds = array<i64: 128, 128>}, {transform_indices = @transform_2, window_bounds = array<i64: 8, 8, 128>}]} {
    %c0_i32 = arith.constant 0 : i32
    %0 = arith.cmpi eq, %arg1, %c0_i32 : i32
    %1 = arith.extui %0 : i1 to i32
    %c0_i32_0 = arith.constant 0 : i32
    %2 = arith.cmpi ne, %1, %c0_i32_0 : i32
    scf.if %2 {
      %cst_60 = arith.constant 0.000000e+00 : f32
      %93 = vector.broadcast %cst_60 : f32 to vector<8x128xf32>
      %c0_61 = arith.constant 0 : index
      %c0_62 = arith.constant 0 : index
      %94 = vector.load %arg5[%c0_61, %c0_62] : memref<8x128xf32, #tpu.memory_space<vmem>>, vector<8x128xf32>
      tpu.vector_store %arg5[%c0_61, %c0_62], %93 {strides = array<i32>} : memref<8x128xf32, #tpu.memory_space<vmem>>, vector<8x128xf32>,
    } else {
    }
    %c0 = arith.constant 0 : index
    %c0_1 = arith.constant 0 : index
    %3 = vector.load %arg5[%c0, %c0_1] : memref<8x128xf32, #tpu.memory_space<vmem>>, vector<8x128xf32>
    %c0_i32_2 = arith.constant 0 : i32
    %4 = arith.index_cast %c0_i32_2 : i32 to index
    %c0_3 = arith.constant 0 : index
    %c0_4 = arith.constant 0 : index
    %5 = vector.load %arg2[%4, %c0_3, %c0_4] : memref<8x8x128xf32, #tpu.memory_space<vmem>>, vector<1x8x128xf32>
    %6 = vector.shape_cast %5 : vector<1x8x128xf32> to vector<8x128xf32>
    %c0_5 = arith.constant 0 : index
    %c0_6 = arith.constant 0 : index
    %7 = vector.load %arg3[%c0_5, %c0_6] : memref<128x128xf32, #tpu.memory_space<vmem>>, vector<128x128xf32>
    %cst = arith.constant dense<0.000000e+00> : vector<8x128xf32>
    %8 = tpu.matmul %3, %7, %cst {dimension_numbers = #tpu.dot_dimension_numbers<[1], [0], [0], [1], [0, 0, 1, 1], [], []>} : vector<8x128xf32>, vector<128x128xf32>, vector<8x128xf32> -> vector<8x128xf32>
    %9 = arith.addf %6, %8 : vector<8x128xf32>
    %10 = math.tanh %9 : vector<8x128xf32>
    %11 = arith.index_cast %c0_i32_2 : i32 to index
    %c0_7 = arith.constant 0 : index
    %c0_8 = arith.constant 0 : index
    %12 = vector.load %arg4[%11, %c0_7, %c0_8] : memref<8x8x128xf32, #tpu.memory_space<vmem>>, vector<1x8x128xf32>
    %13 = vector.shape_cast %12 : vector<1x8x128xf32> to vector<8x128xf32>
    %14 = vector.shape_cast %10 : vector<8x128xf32> to vector<1x8x128xf32>
    tpu.vector_store %arg4[%11, %c0_7, %c0_8], %14 {strides = array<i32>} : memref<8x8x128xf32, #tpu.memory_space<vmem>>, vector<1x8x128xf32>,
    %c1_i32 = arith.constant 1 : i32
    %15 = arith.index_cast %c1_i32 : i32 to index
    %c0_9 = arith.constant 0 : index
    %c0_10 = arith.constant 0 : index
    %16 = vector.load %arg2[%15, %c0_9, %c0_10] : memref<8x8x128xf32, #tpu.memory_space<vmem>>, vector<1x8x128xf32>
    %17 = vector.shape_cast %16 : vector<1x8x128xf32> to vector<8x128xf32>
    %c0_11 = arith.constant 0 : index
    %c0_12 = arith.constant 0 : index
    %18 = vector.load %arg3[%c0_11, %c0_12] : memref<128x128xf32, #tpu.memory_space<vmem>>, vector<128x128xf32>
    %cst_13 = arith.constant dense<0.000000e+00> : vector<8x128xf32>
    %19 = tpu.matmul %10, %18, %cst_13 {dimension_numbers = #tpu.dot_dimension_numbers<[1], [0], [0], [1], [0, 0, 1, 1], [], []>} : vector<8x128xf32>, vector<128x128xf32>, vector<8x128xf32> -> vector<8x128xf32>
    %20 = arith.addf %17, %19 : vector<8x128xf32>
    %21 = math.tanh %20 : vector<8x128xf32>
    %22 = arith.index_cast %c1_i32 : i32 to index
    %c0_14 = arith.constant 0 : index
    %c0_15 = arith.constant 0 : index
    %23 = vector.load %arg4[%22, %c0_14, %c0_15] : memref<8x8x128xf32, #tpu.memory_space<vmem>>, vector<1x8x128xf32>
    %24 = vector.shape_cast %23 : vector<1x8x128xf32> to vector<8x128xf32>
    %25 = vector.shape_cast %21 : vector<8x128xf32> to vector<1x8x128xf32>
    tpu.vector_store %arg4[%22, %c0_14, %c0_15], %25 {strides = array<i32>} : memref<8x8x128xf32, #tpu.memory_space<vmem>>, vector<1x8x128xf32>,
    %c2_i32 = arith.constant 2 : i32
    %26 = arith.index_cast %c2_i32 : i32 to index
    %c0_16 = arith.constant 0 : index
    %c0_17 = arith.constant 0 : index
    %27 = vector.load %arg2[%26, %c0_16, %c0_17] : memref<8x8x128xf32, #tpu.memory_space<vmem>>, vector<1x8x128xf32>
    %28 = vector.shape_cast %27 : vector<1x8x128xf32> to vector<8x128xf32>
    %c0_18 = arith.constant 0 : index
    %c0_19 = arith.constant 0 : index
    %29 = vector.load %arg3[%c0_18, %c0_19] : memref<128x128xf32, #tpu.memory_space<vmem>>, vector<128x128xf32>
    %cst_20 = arith.constant dense<0.000000e+00> : vector<8x128xf32>
    %30 = tpu.matmul %21, %29, %cst_20 {dimension_numbers = #tpu.dot_dimension_numbers<[1], [0], [0], [1], [0, 0, 1, 1], [], []>} : vector<8x128xf32>, vector<128x128xf32>, vector<8x128xf32> -> vector<8x128xf32>
    %31 = arith.addf %28, %30 : vector<8x128xf32>
    %32 = math.tanh %31 : vector<8x128xf32>
    %33 = arith.index_cast %c2_i32 : i32 to index
    %c0_21 = arith.constant 0 : index
    %c0_22 = arith.constant 0 : index
    %34 = vector.load %arg4[%33, %c0_21, %c0_22] : memref<8x8x128xf32, #tpu.memory_space<vmem>>, vector<1x8x128xf32>
    %35 = vector.shape_cast %34 : vector<1x8x128xf32> to vector<8x128xf32>
    %36 = vector.shape_cast %32 : vector<8x128xf32> to vector<1x8x128xf32>
    tpu.vector_store %arg4[%33, %c0_21, %c0_22], %36 {strides = array<i32>} : memref<8x8x128xf32, #tpu.memory_space<vmem>>, vector<1x8x128xf32>,
    %c3_i32 = arith.constant 3 : i32
    %37 = arith.index_cast %c3_i32 : i32 to index
    %c0_23 = arith.constant 0 : index
    %c0_24 = arith.constant 0 : index
    %38 = vector.load %arg2[%37, %c0_23, %c0_24] : memref<8x8x128xf32, #tpu.memory_space<vmem>>, vector<1x8x128xf32>
    %39 = vector.shape_cast %38 : vector<1x8x128xf32> to vector<8x128xf32>
    %c0_25 = arith.constant 0 : index
    %c0_26 = arith.constant 0 : index
    %40 = vector.load %arg3[%c0_25, %c0_26] : memref<128x128xf32, #tpu.memory_space<vmem>>, vector<128x128xf32>
    %cst_27 = arith.constant dense<0.000000e+00> : vector<8x128xf32>
    %41 = tpu.matmul %32, %40, %cst_27 {dimension_numbers = #tpu.dot_dimension_numbers<[1], [0], [0], [1], [0, 0, 1, 1], [], []>} : vector<8x128xf32>, vector<128x128xf32>, vector<8x128xf32> -> vector<8x128xf32>
    %42 = arith.addf %39, %41 : vector<8x128xf32>
    %43 = math.tanh %42 : vector<8x128xf32>
    %44 = arith.index_cast %c3_i32 : i32 to index
    %c0_28 = arith.constant 0 : index
    %c0_29 = arith.constant 0 : index
    %45 = vector.load %arg4[%44, %c0_28, %c0_29] : memref<8x8x128xf32, #tpu.memory_space<vmem>>, vector<1x8x128xf32>
    %46 = vector.shape_cast %45 : vector<1x8x128xf32> to vector<8x128xf32>
    %47 = vector.shape_cast %43 : vector<8x128xf32> to vector<1x8x128xf32>
    tpu.vector_store %arg4[%44, %c0_28, %c0_29], %47 {strides = array<i32>} : memref<8x8x128xf32, #tpu.memory_space<vmem>>, vector<1x8x128xf32>,
    %c4_i32 = arith.constant 4 : i32
    %48 = arith.index_cast %c4_i32 : i32 to index
    %c0_30 = arith.constant 0 : index
    %c0_31 = arith.constant 0 : index
    %49 = vector.load %arg2[%48, %c0_30, %c0_31] : memref<8x8x128xf32, #tpu.memory_space<vmem>>, vector<1x8x128xf32>
    %50 = vector.shape_cast %49 : vector<1x8x128xf32> to vector<8x128xf32>
    %c0_32 = arith.constant 0 : index
    %c0_33 = arith.constant 0 : index
    %51 = vector.load %arg3[%c0_32, %c0_33] : memref<128x128xf32, #tpu.memory_space<vmem>>, vector<128x128xf32>
    %cst_34 = arith.constant dense<0.000000e+00> : vector<8x128xf32>
    %52 = tpu.matmul %43, %51, %cst_34 {dimension_numbers = #tpu.dot_dimension_numbers<[1], [0], [0], [1], [0, 0, 1, 1], [], []>} : vector<8x128xf32>, vector<128x128xf32>, vector<8x128xf32> -> vector<8x128xf32>
    %53 = arith.addf %50, %52 : vector<8x128xf32>
    %54 = math.tanh %53 : vector<8x128xf32>
    %55 = arith.index_cast %c4_i32 : i32 to index
    %c0_35 = arith.constant 0 : index
    %c0_36 = arith.constant 0 : index
    %56 = vector.load %arg4[%55, %c0_35, %c0_36] : memref<8x8x128xf32, #tpu.memory_space<vmem>>, vector<1x8x128xf32>
    %57 = vector.shape_cast %56 : vector<1x8x128xf32> to vector<8x128xf32>
    %58 = vector.shape_cast %54 : vector<8x128xf32> to vector<1x8x128xf32>
    tpu.vector_store %arg4[%55, %c0_35, %c0_36], %58 {strides = array<i32>} : memref<8x8x128xf32, #tpu.memory_space<vmem>>, vector<1x8x128xf32>,
    %c5_i32 = arith.constant 5 : i32
    %59 = arith.index_cast %c5_i32 : i32 to index
    %c0_37 = arith.constant 0 : index
    %c0_38 = arith.constant 0 : index
    %60 = vector.load %arg2[%59, %c0_37, %c0_38] : memref<8x8x128xf32, #tpu.memory_space<vmem>>, vector<1x8x128xf32>
    %61 = vector.shape_cast %60 : vector<1x8x128xf32> to vector<8x128xf32>
    %c0_39 = arith.constant 0 : index
    %c0_40 = arith.constant 0 : index
    %62 = vector.load %arg3[%c0_39, %c0_40] : memref<128x128xf32, #tpu.memory_space<vmem>>, vector<128x128xf32>
    %cst_41 = arith.constant dense<0.000000e+00> : vector<8x128xf32>
    %63 = tpu.matmul %54, %62, %cst_41 {dimension_numbers = #tpu.dot_dimension_numbers<[1], [0], [0], [1], [0, 0, 1, 1], [], []>} : vector<8x128xf32>, vector<128x128xf32>, vector<8x128xf32> -> vector<8x128xf32>
    %64 = arith.addf %61, %63 : vector<8x128xf32>
    %65 = math.tanh %64 : vector<8x128xf32>
    %66 = arith.index_cast %c5_i32 : i32 to index
    %c0_42 = arith.constant 0 : index
    %c0_43 = arith.constant 0 : index
    %67 = vector.load %arg4[%66, %c0_42, %c0_43] : memref<8x8x128xf32, #tpu.memory_space<vmem>>, vector<1x8x128xf32>
    %68 = vector.shape_cast %67 : vector<1x8x128xf32> to vector<8x128xf32>
    %69 = vector.shape_cast %65 : vector<8x128xf32> to vector<1x8x128xf32>
    tpu.vector_store %arg4[%66, %c0_42, %c0_43], %69 {strides = array<i32>} : memref<8x8x128xf32, #tpu.memory_space<vmem>>, vector<1x8x128xf32>,
    %c6_i32 = arith.constant 6 : i32
    %70 = arith.index_cast %c6_i32 : i32 to index
    %c0_44 = arith.constant 0 : index
    %c0_45 = arith.constant 0 : index
    %71 = vector.load %arg2[%70, %c0_44, %c0_45] : memref<8x8x128xf32, #tpu.memory_space<vmem>>, vector<1x8x128xf32>
    %72 = vector.shape_cast %71 : vector<1x8x128xf32> to vector<8x128xf32>
    %c0_46 = arith.constant 0 : index
    %c0_47 = arith.constant 0 : index
    %73 = vector.load %arg3[%c0_46, %c0_47] : memref<128x128xf32, #tpu.memory_space<vmem>>, vector<128x128xf32>
    %cst_48 = arith.constant dense<0.000000e+00> : vector<8x128xf32>
    %74 = tpu.matmul %65, %73, %cst_48 {dimension_numbers = #tpu.dot_dimension_numbers<[1], [0], [0], [1], [0, 0, 1, 1], [], []>} : vector<8x128xf32>, vector<128x128xf32>, vector<8x128xf32> -> vector<8x128xf32>
    %75 = arith.addf %72, %74 : vector<8x128xf32>
    %76 = math.tanh %75 : vector<8x128xf32>
    %77 = arith.index_cast %c6_i32 : i32 to index
    %c0_49 = arith.constant 0 : index
    %c0_50 = arith.constant 0 : index
    %78 = vector.load %arg4[%77, %c0_49, %c0_50] : memref<8x8x128xf32, #tpu.memory_space<vmem>>, vector<1x8x128xf32>
    %79 = vector.shape_cast %78 : vector<1x8x128xf32> to vector<8x128xf32>
    %80 = vector.shape_cast %76 : vector<8x128xf32> to vector<1x8x128xf32>
    tpu.vector_store %arg4[%77, %c0_49, %c0_50], %80 {strides = array<i32>} : memref<8x8x128xf32, #tpu.memory_space<vmem>>, vector<1x8x128xf32>,
    %c7_i32 = arith.constant 7 : i32
    %81 = arith.index_cast %c7_i32 : i32 to index
    %c0_51 = arith.constant 0 : index
    %c0_52 = arith.constant 0 : index
    %82 = vector.load %arg2[%81, %c0_51, %c0_52] : memref<8x8x128xf32, #tpu.memory_space<vmem>>, vector<1x8x128xf32>
    %83 = vector.shape_cast %82 : vector<1x8x128xf32> to vector<8x128xf32>
    %c0_53 = arith.constant 0 : index
    %c0_54 = arith.constant 0 : index
    %84 = vector.load %arg3[%c0_53, %c0_54] : memref<128x128xf32, #tpu.memory_space<vmem>>, vector<128x128xf32>
    %cst_55 = arith.constant dense<0.000000e+00> : vector<8x128xf32>
    %85 = tpu.matmul %76, %84, %cst_55 {dimension_numbers = #tpu.dot_dimension_numbers<[1], [0], [0], [1], [0, 0, 1, 1], [], []>} : vector<8x128xf32>, vector<128x128xf32>, vector<8x128xf32> -> vector<8x128xf32>
    %86 = arith.addf %83, %85 : vector<8x128xf32>
    %87 = math.tanh %86 : vector<8x128xf32>
    %88 = arith.index_cast %c7_i32 : i32 to index
    %c0_56 = arith.constant 0 : index
    %c0_57 = arith.constant 0 : index
    %89 = vector.load %arg4[%88, %c0_56, %c0_57] : memref<8x8x128xf32, #tpu.memory_space<vmem>>, vector<1x8x128xf32>
    %90 = vector.shape_cast %89 : vector<1x8x128xf32> to vector<8x128xf32>
    %91 = vector.shape_cast %87 : vector<8x128xf32> to vector<1x8x128xf32>
    tpu.vector_store %arg4[%88, %c0_56, %c0_57], %91 {strides = array<i32>} : memref<8x8x128xf32, #tpu.memory_space<vmem>>, vector<1x8x128xf32>,
    %c8_i32 = arith.constant 8 : i32
    %c0_58 = arith.constant 0 : index
    %c0_59 = arith.constant 0 : index
    %92 = vector.load %arg5[%c0_58, %c0_59] : memref<8x128xf32, #tpu.memory_space<vmem>>, vector<8x128xf32>
    tpu.vector_store %arg5[%c0_58, %c0_59], %87 {strides = array<i32>} : memref<8x128xf32, #tpu.memory_space<vmem>>, vector<8x128xf32>,
    return
  }
  func.func @transform_0(%arg0: i32, %arg1: i32) -> (i32, i32, i32) {
    %c0_i32 = arith.constant 0 : i32
    %c0_i32_0 = arith.constant 0 : i32
    return %arg1, %arg0, %c0_i32 : i32, i32, i32
  }
  func.func @transform_1(%arg0: i32, %arg1: i32) -> (i32, i32) {
    %c0_i32 = arith.constant 0 : i32
    %c0_i32_0 = arith.constant 0 : i32
    %c0_i32_1 = arith.constant 0 : i32
    return %c0_i32, %c0_i32_0 : i32, i32
  }
  func.func @transform_2(%arg0: i32, %arg1: i32) -> (i32, i32, i32) {
    %c0_i32 = arith.constant 0 : i32
    %c0_i32_0 = arith.constant 0 : i32
    return %arg1, %arg0, %c0_i32 : i32, i32, i32
  }
}

</mosaic_0001>

<bundles_post_ra>
// kernel: rnn_model_forward.2
= control target key start
LH: loop header
LB: loop body
LE: loop exit
PB: predicated region body
PF: predicated region fallthrough
CT: control target
= control target key end

     0   :  { %v1204_v0 = vmov 0.0   ;;  %vm1205_vm0 = vmmov 0   ;;  %s1622_s1 = inlined_call_operand.vmem [shape: f32[128,128], index: 1, kind: input, shape index: {}]   ;;  %s1623_s0 = inlined_call_operand.vmem [shape: f32[8,8,128], index: 0, kind: input, shape index: {}]   ;;  %s1624_s2 = inlined_call_operand.vmem [shape: f32[8,8,128], index: 2, kind: output, shape index: {}]  }
   0x1   :  { %906 = vmatprep.subr.mxu0 %v1204_v0  ;;  %v1225_v1 = vld [vmem:[%s1622_s1 + $0x78] sm:$0xff]  ;;  %v1230_v2 = vld [vmem:[%s1622_s1 + $0x70] sm:$0xff]  ;;  %938 = vmatprep.mubr.msk.f32.mxu0 %vm1205_vm0, %v1204_v0  ;;  %v1240_v3 = vld [vmem:[%s1622_s1 + $0x68] sm:$0xff] }
   0x2   :  { %907 = vmatpush3.msra.mxu0 %v1225_v1  ;;  %941 = vmatprep.subr.mxu1 %v1204_v0  ;;  %v1249_v4 = vld [vmem:[%s1622_s1 + $0x60] sm:$0xff]  ;;  %v1258_v5 = vld [vmem:[%s1622_s1 + $0x58] sm:$0xff]  ;;  %v1267_v6 = vld [vmem:[%s1622_s1 + $0x50] sm:$0xff] }
   0x3   :  { %908 = vmatprep.subr.mxu0 %v1204_v0  ;;  %942 = vmatpush3.msra.mxu1 %v1225_v1  ;;  %v1276_v7 = vld [vmem:[%s1622_s1 + $0x48] sm:$0xff]  ;;  %v1285_v8 = vld [vmem:[%s1622_s1 + $0x40] sm:$0xff]  ;;  %v1294_v9 = vld [vmem:[%s1622_s1 + $0x38] sm:$0xff] }
   0x4   :  { %909 = vmatpush3.msra.mxu0 %v1230_v2  ;;  %943 = vmatprep.subr.mxu1 %v1204_v0  ;;  %v1303_v10 = vld [vmem:[%s1622_s1 + $0x30] sm:$0xff]  ;;  %v1312_v11 = vld [vmem:[%s1622_s1 + $0x28] sm:$0xff]  ;;  %v1321_v12 = vld [vmem:[%s1622_s1 + $0x20] sm:$0xff] }
   0x5   :  { %910 = vmatprep.subr.mxu0 %v1204_v0  ;;  %944 = vmatpush3.msra.mxu1 %v1230_v2  ;;  %v1330_v13 = vld [vmem:[%s1622_s1 + $0x18] sm:$0xff]  ;;  %v1339_v14 = vld [vmem:[%s1622_s1 + $0x10] sm:$0xff]  ;;  %v1348_v15 = vld [vmem:[%s1622_s1 + $0x8] sm:$0xff] }
   0x6   :  { %911 = vmatpush3.msra.mxu0 %v1240_v3  ;;  %945 = vmatprep.subr.mxu1 %v1204_v0  ;;  %v1357_v16 = vld [vmem:[%s1622_s1] sm:$0xff]  ;;  %v756_v22 = vld [vmem:[%s1623_s0 + $0x8] sm:$0xff]  ;;  %v758_v27 = vld [vmem:[%s1623_s0 + $0x10] sm:$0xff] }
   0x7   :  { %912 = vmatprep.subr.mxu0 %v1204_v0  ;;  %946 = vmatpush3.msra.mxu1 %v1240_v3  ;;  %v17_v17 = vld [vmem:[%s1623_s0] sm:$0xff]  ;;  %v760_v32 = vld [vmem:[%s1623_s0 + $0x18] sm:$0xff]  ;;  %v764_v42 = vld [vmem:[%s1623_s0 + $0x28] sm:$0xff] }
   0x8   :  { %913 = vmatpush3.msra.mxu0 %v1249_v4  ;;  %947 = vmatprep.subr.mxu1 %v1204_v0  ;;  %v762_v37 = vld [vmem:[%s1623_s0 + $0x20] sm:$0xff]  ;;  %v766_v47 = vld [vmem:[%s1623_s0 + $0x30] sm:$0xff]  ;;  %v768_v52 = vld [vmem:[%s1623_s0 + $0x38] sm:$0xff] }
   0x9   :  { %914 = vmatprep.subr.mxu0 %v1204_v0  ;;  %948 = vmatpush3.msra.mxu1 %v1249_v4 }
   0xa   :  { %915 = vmatpush3.msra.mxu0 %v1258_v5  ;;  %949 = vmatprep.subr.mxu1 %v1204_v0 }
   0xb   :  { %916 = vmatprep.subr.mxu0 %v1204_v0  ;;  %950 = vmatpush3.msra.mxu1 %v1258_v5 }
   0xc   :  { %917 = vmatpush3.msra.mxu0 %v1267_v6  ;;  %951 = vmatprep.subr.mxu1 %v1204_v0 }
   0xd   :  { %918 = vmatprep.subr.mxu0 %v1204_v0  ;;  %952 = vmatpush3.msra.mxu1 %v1267_v6 }
   0xe   :  { %919 = vmatpush3.msra.mxu0 %v1276_v7  ;;  %953 = vmatprep.subr.mxu1 %v1204_v0 }
   0xf   :  { %920 = vmatprep.subr.mxu0 %v1204_v0  ;;  %954 = vmatpush3.msra.mxu1 %v1276_v7 }
  0x10   :  { %921 = vmatpush3.msra.mxu0 %v1285_v8  ;;  %955 = vmatprep.subr.mxu1 %v1204_v0 }
  0x11   :  { %922 = vmatprep.subr.mxu0 %v1204_v0  ;;  %956 = vmatpush3.msra.mxu1 %v1285_v8 }
  0x12   :  { %923 = vmatpush3.msra.mxu0 %v1294_v9  ;;  %957 = vmatprep.subr.mxu1 %v1204_v0 }
  0x13   :  { %924 = vmatprep.subr.mxu0 %v1204_v0  ;;  %958 = vmatpush3.msra.mxu1 %v1294_v9 }
  0x14   :  { %925 = vmatpush3.msra.mxu0 %v1303_v10  ;;  %959 = vmatprep.subr.mxu1 %v1204_v0 }
  0x15   :  { %926 = vmatprep.subr.mxu0 %v1204_v0  ;;  %960 = vmatpush3.msra.mxu1 %v1303_v10 }
  0x16   :  { %927 = vmatpush3.msra.mxu0 %v1312_v11  ;;  %961 = vmatprep.subr.mxu1 %v1204_v0 }
  0x17   :  { %928 = vmatprep.subr.mxu0 %v1204_v0  ;;  %962 = vmatpush3.msra.mxu1 %v1312_v11 }
  0x18   :  { %929 = vmatpush3.msra.mxu0 %v1321_v12  ;;  %963 = vmatprep.subr.mxu1 %v1204_v0 }
  0x19   :  { %930 = vmatprep.subr.mxu0 %v1204_v0  ;;  %964 = vmatpush3.msra.mxu1 %v1321_v12 }
  0x1a   :  { %931 = vmatpush3.msra.mxu0 %v1330_v13  ;;  %965 = vmatprep.subr.mxu1 %v1204_v0 }
  0x1b   :  { %932 = vmatprep.subr.mxu0 %v1204_v0  ;;  %966 = vmatpush3.msra.mxu1 %v1330_v13 }
  0x1c   :  { %933 = vmatpush3.msra.mxu0 %v1339_v14  ;;  %967 = vmatprep.subr.mxu1 %v1204_v0 }
  0x1d   :  { %934 = vmatprep.subr.mxu0 %v1204_v0  ;;  %968 = vmatpush3.msra.mxu1 %v1339_v14 }
  0x1e   :  { %935 = vmatpush3.msra.mxu0 %v1348_v15  ;;  %969 = vmatprep.subr.mxu1 %v1204_v0 }
  0x1f   :  { %936 = vmatprep.subr.mxu0 %v1204_v0  ;;  %970 = vmatpush3.msra.mxu1 %v1348_v15 }
  0x20   :  { %937 = vmatpush3.msra.mxu0 %v1357_v16  ;;  %971 = vmatprep.subr.mxu1 %v1204_v0 }
  0x21   :  { %939 = vmatmul.mubr.f32.vlgmr.msra.gmra.mxu0 %v1204_v0  ;;  %972 = vmatpush3.msra.mxu1 %v1357_v16 }
  0x22   :  { %973 = vmatprep.mubr.msk.f32.mxu1 %vm1205_vm0, %v1204_v0  ;;  %976 = vmatprep.subr.mxu0 %v1204_v0 }
  0x23   :  { %977 = vmatpush3.msra.mxu0 %v1225_v1  ;;  %1008 = vmatprep.mubr.msk.f32.mxu0 %vm1205_vm0, %v1204_v0 }
  0x24   :  { %978 = vmatprep.subr.mxu0 %v1204_v0  ;;  %1011 = vmatprep.subr.mxu1 %v1204_v0 }
  0x25   :  { %979 = vmatpush3.msra.mxu0 %v1230_v2 }
  0x26   :  { %980 = vmatprep.subr.mxu0 %v1204_v0 }
  0x27   :  { %981 = vmatpush3.msra.mxu0 %v1240_v3 }
  0x28   :  { %982 = vmatprep.subr.mxu0 %v1204_v0 }
  0x29   :  { %983 = vmatpush3.msra.mxu0 %v1249_v4 }
  0x2a   :  { %984 = vmatprep.subr.mxu0 %v1204_v0 }
  0x2b   :  { %985 = vmatpush3.msra.mxu0 %v1258_v5 }
  0x2c   :  { %986 = vmatprep.subr.mxu0 %v1204_v0 }
  0x2d   :  { %987 = vmatpush3.msra.mxu0 %v1267_v6 }
  0x2e   :  { %988 = vmatprep.subr.mxu0 %v1204_v0 }
  0x2f   :  { %989 = vmatpush3.msra.mxu0 %v1276_v7 }
  0x30   :  { %990 = vmatprep.subr.mxu0 %v1204_v0 }
  0x31   :  { %991 = vmatpush3.msra.mxu0 %v1285_v8 }
  0x32   :  { %992 = vmatprep.subr.mxu0 %v1204_v0 }
  0x33   :  { %993 = vmatpush3.msra.mxu0 %v1294_v9 }
  0x34   :  { %994 = vmatprep.subr.mxu0 %v1204_v0 }
  0x35   :  { %995 = vmatpush3.msra.mxu0 %v1303_v10 }
  0x36   :  { %996 = vmatprep.subr.mxu0 %v1204_v0 }
  0x37   :  { %997 = vmatpush3.msra.mxu0 %v1312_v11 }
  0x38   :  { %998 = vmatprep.subr.mxu0 %v1204_v0 }
  0x39   :  { %999 = vmatpush3.msra.mxu0 %v1321_v12 }
  0x3a   :  { %1000 = vmatprep.subr.mxu0 %v1204_v0 }
  0x3b   :  { %1001 = vmatpush3.msra.mxu0 %v1330_v13 }
  0x3c   :  { %1002 = vmatprep.subr.mxu0 %v1204_v0 }
  0x3d   :  { %1003 = vmatpush3.msra.mxu0 %v1339_v14 }
  0x3e   :  { %1004 = vmatprep.subr.mxu0 %v1204_v0 }
  0x3f   :  { %1005 = vmatpush3.msra.mxu0 %v1348_v15 }
  0x40   :  { %1006 = vmatprep.subr.mxu0 %v1204_v0 }
  0x41   :  { %1007 = vmatpush3.msra.mxu0 %v1357_v16 }
  0x42   :  { %1046 = vmatprep.subr.mxu0 %v1204_v0 }
  0xe1   :  { %v100_v18 = vpop.f32.mrf.mxu0 }
  0xe2   :  { %v104_v19 = vadd.f32 %v100_v18, %v17_v17 }
  0xe3   :  { %v940_v20 = vpop.f32.mrf.mxu0 }
  0xe4   :  { %1188 = vtanh.f32 %v104_v19 }
  0xf1   :  { %v1189_v21 = vpop.eup %1188 }
  0xf2   :  { %106 = vst [vmem:[%s1624_s2] sm:$0xff] %v1189_v21  ;;  %974 = vmatmul.mubr.f32.vlgmr.msra.gmra.mxu1 %v1189_v21 }
  0xf3   :  { %1012 = vmatpush3.msra.mxu1 %v1225_v1  ;;  %1043 = vmatprep.mubr.msk.f32.mxu1 %vm1205_vm0, %v1204_v0 }
  0xf4   :  { %1013 = vmatprep.subr.mxu1 %v1204_v0 }
  0xf5   :  { %1014 = vmatpush3.msra.mxu1 %v1230_v2 }
  0xf6   :  { %1015 = vmatprep.subr.mxu1 %v1204_v0 }
  0xf7   :  { %1016 = vmatpush3.msra.mxu1 %v1240_v3 }
  0xf8   :  { %1017 = vmatprep.subr.mxu1 %v1204_v0 }
  0xf9   :  { %1018 = vmatpush3.msra.mxu1 %v1249_v4 }
  0xfa   :  { %1019 = vmatprep.subr.mxu1 %v1204_v0 }
  0xfb   :  { %1020 = vmatpush3.msra.mxu1 %v1258_v5 }
  0xfc   :  { %1021 = vmatprep.subr.mxu1 %v1204_v0 }
  0xfd   :  { %1022 = vmatpush3.msra.mxu1 %v1267_v6 }
  0xfe   :  { %1023 = vmatprep.subr.mxu1 %v1204_v0 }
  0xff   :  { %1024 = vmatpush3.msra.mxu1 %v1276_v7 }
 0x100   :  { %1025 = vmatprep.subr.mxu1 %v1204_v0 }
 0x101   :  { %1026 = vmatpush3.msra.mxu1 %v1285_v8 }
 0x102   :  { %1027 = vmatprep.subr.mxu1 %v1204_v0 }
 0x103   :  { %1028 = vmatpush3.msra.mxu1 %v1294_v9 }
 0x104   :  { %1029 = vmatprep.subr.mxu1 %v1204_v0 }
 0x105   :  { %1030 = vmatpush3.msra.mxu1 %v1303_v10 }
 0x106   :  { %1031 = vmatprep.subr.mxu1 %v1204_v0 }
 0x107   :  { %1032 = vmatpush3.msra.mxu1 %v1312_v11 }
 0x108   :  { %1033 = vmatprep.subr.mxu1 %v1204_v0 }
 0x109   :  { %1034 = vmatpush3.msra.mxu1 %v1321_v12 }
 0x10a   :  { %1035 = vmatprep.subr.mxu1 %v1204_v0 }
 0x10b   :  { %1036 = vmatpush3.msra.mxu1 %v1330_v13 }
 0x10c   :  { %1037 = vmatprep.subr.mxu1 %v1204_v0 }
 0x10d   :  { %1038 = vmatpush3.msra.mxu1 %v1339_v14 }
 0x10e   :  { %1039 = vmatprep.subr.mxu1 %v1204_v0 }
 0x10f   :  { %1040 = vmatpush3.msra.mxu1 %v1348_v15 }
 0x110   :  { %1041 = vmatprep.subr.mxu1 %v1204_v0 }
 0x111   :  { %1042 = vmatpush3.msra.mxu1 %v1357_v16 }
 0x112   :  { %1081 = vmatprep.subr.mxu1 %v1204_v0 }
 0x1b2   :  { %v191_v23 = vpop.f32.mrf.mxu1 }
 0x1b3   :  { %v195_v24 = vadd.f32 %v756_v22, %v191_v23 }
 0x1b4   :  { %v975_v25 = vpop.f32.mrf.mxu1 }
 0x1b5   :  { %1190 = vtanh.f32 %v195_v24 }
 0x1c2   :  { %v1191_v26 = vpop.eup %1190 }
 0x1c3   :  { %757 = vst [vmem:[%s1624_s2 + $0x8] sm:$0xff] %v1191_v26  ;;  %1009 = vmatmul.mubr.f32.vlgmr.msra.gmra.mxu0 %v1191_v26 }
 0x1c4   :  { %1047 = vmatpush3.msra.mxu0 %v1225_v1  ;;  %1078 = vmatprep.mubr.msk.f32.mxu0 %vm1205_vm0, %v1204_v0 }
 0x1c5   :  { %1048 = vmatprep.subr.mxu0 %v1204_v0 }
 0x1c6   :  { %1049 = vmatpush3.msra.mxu0 %v1230_v2 }
 0x1c7   :  { %1050 = vmatprep.subr.mxu0 %v1204_v0 }
 0x1c8   :  { %1051 = vmatpush3.msra.mxu0 %v1240_v3 }
 0x1c9   :  { %1052 = vmatprep.subr.mxu0 %v1204_v0 }
 0x1ca   :  { %1053 = vmatpush3.msra.mxu0 %v1249_v4 }
 0x1cb   :  { %1054 = vmatprep.subr.mxu0 %v1204_v0 }
 0x1cc   :  { %1055 = vmatpush3.msra.mxu0 %v1258_v5 }
 0x1cd   :  { %1056 = vmatprep.subr.mxu0 %v1204_v0 }
 0x1ce   :  { %1057 = vmatpush3.msra.mxu0 %v1267_v6 }
 0x1cf   :  { %1058 = vmatprep.subr.mxu0 %v1204_v0 }
 0x1d0   :  { %1059 = vmatpush3.msra.mxu0 %v1276_v7 }
 0x1d1   :  { %1060 = vmatprep.subr.mxu0 %v1204_v0 }
 0x1d2   :  { %1061 = vmatpush3.msra.mxu0 %v1285_v8 }
 0x1d3   :  { %1062 = vmatprep.subr.mxu0 %v1204_v0 }
 0x1d4   :  { %1063 = vmatpush3.msra.mxu0 %v1294_v9 }
 0x1d5   :  { %1064 = vmatprep.subr.mxu0 %v1204_v0 }
 0x1d6   :  { %1065 = vmatpush3.msra.mxu0 %v1303_v10 }
 0x1d7   :  { %1066 = vmatprep.subr.mxu0 %v1204_v0 }
 0x1d8   :  { %1067 = vmatpush3.msra.mxu0 %v1312_v11 }
 0x1d9   :  { %1068 = vmatprep.subr.mxu0 %v1204_v0 }
 0x1da   :  { %1069 = vmatpush3.msra.mxu0 %v1321_v12 }
 0x1db   :  { %1070 = vmatprep.subr.mxu0 %v1204_v0 }
 0x1dc   :  { %1071 = vmatpush3.msra.mxu0 %v1330_v13 }
 0x1dd   :  { %1072 = vmatprep.subr.mxu0 %v1204_v0 }
 0x1de   :  { %1073 = vmatpush3.msra.mxu0 %v1339_v14 }
 0x1df   :  { %1074 = vmatprep.subr.mxu0 %v1204_v0 }
 0x1e0   :  { %1075 = vmatpush3.msra.mxu0 %v1348_v15 }
 0x1e1   :  { %1076 = vmatprep.subr.mxu0 %v1204_v0 }
 0x1e2   :  { %1077 = vmatpush3.msra.mxu0 %v1357_v16 }
 0x1e3   :  { %1116 = vmatprep.subr.mxu0 %v1204_v0 }
 0x283   :  { %v283_v28 = vpop.f32.mrf.mxu0 }
 0x284   :  { %v287_v29 = vadd.f32 %v758_v27, %v283_v28 }
 0x285   :  { %v1010_v30 = vpop.f32.mrf.mxu0 }
 0x286   :  { %1192 = vtanh.f32 %v287_v29 }
 0x293   :  { %v1193_v31 = vpop.eup %1192 }
 0x294   :  { %759 = vst [vmem:[%s1624_s2 + $0x10] sm:$0xff] %v1193_v31  ;;  %1044 = vmatmul.mubr.f32.vlgmr.msra.gmra.mxu1 %v1193_v31 }
 0x295   :  { %1082 = vmatpush3.msra.mxu1 %v1225_v1  ;;  %1113 = vmatprep.mubr.msk.f32.mxu1 %vm1205_vm0, %v1204_v0 }
 0x296   :  { %1083 = vmatprep.subr.mxu1 %v1204_v0 }
 0x297   :  { %1084 = vmatpush3.msra.mxu1 %v1230_v2 }
 0x298   :  { %1085 = vmatprep.subr.mxu1 %v1204_v0 }
 0x299   :  { %1086 = vmatpush3.msra.mxu1 %v1240_v3 }
 0x29a   :  { %1087 = vmatprep.subr.mxu1 %v1204_v0 }
 0x29b   :  { %1088 = vmatpush3.msra.mxu1 %v1249_v4 }
 0x29c   :  { %1089 = vmatprep.subr.mxu1 %v1204_v0 }
 0x29d   :  { %1090 = vmatpush3.msra.mxu1 %v1258_v5 }
 0x29e   :  { %1091 = vmatprep.subr.mxu1 %v1204_v0 }
 0x29f   :  { %1092 = vmatpush3.msra.mxu1 %v1267_v6 }
 0x2a0   :  { %1093 = vmatprep.subr.mxu1 %v1204_v0 }
 0x2a1   :  { %1094 = vmatpush3.msra.mxu1 %v1276_v7 }
 0x2a2   :  { %1095 = vmatprep.subr.mxu1 %v1204_v0 }
 0x2a3   :  { %1096 = vmatpush3.msra.mxu1 %v1285_v8 }
 0x2a4   :  { %1097 = vmatprep.subr.mxu1 %v1204_v0 }
 0x2a5   :  { %1098 = vmatpush3.msra.mxu1 %v1294_v9 }
 0x2a6   :  { %1099 = vmatprep.subr.mxu1 %v1204_v0 }
 0x2a7   :  { %1100 = vmatpush3.msra.mxu1 %v1303_v10 }
 0x2a8   :  { %1101 = vmatprep.subr.mxu1 %v1204_v0 }
 0x2a9   :  { %1102 = vmatpush3.msra.mxu1 %v1312_v11 }
 0x2aa   :  { %1103 = vmatprep.subr.mxu1 %v1204_v0 }
 0x2ab   :  { %1104 = vmatpush3.msra.mxu1 %v1321_v12 }
 0x2ac   :  { %1105 = vmatprep.subr.mxu1 %v1204_v0 }
 0x2ad   :  { %1106 = vmatpush3.msra.mxu1 %v1330_v13 }
 0x2ae   :  { %1107 = vmatprep.subr.mxu1 %v1204_v0 }
 0x2af   :  { %1108 = vmatpush3.msra.mxu1 %v1339_v14 }
 0x2b0   :  { %1109 = vmatprep.subr.mxu1 %v1204_v0 }
 0x2b1   :  { %1110 = vmatpush3.msra.mxu1 %v1348_v15 }
 0x2b2   :  { %1111 = vmatprep.subr.mxu1 %v1204_v0 }
 0x2b3   :  { %1112 = vmatpush3.msra.mxu1 %v1357_v16 }
 0x2b4   :  { %1151 = vmatprep.subr.mxu1 %v1204_v0 }
 0x354   :  { %v375_v33 = vpop.f32.mrf.mxu1 }
 0x355   :  { %v379_v34 = vadd.f32 %v760_v32, %v375_v33 }
 0x356   :  { %v1045_v35 = vpop.f32.mrf.mxu1 }
 0x357   :  { %1194 = vtanh.f32 %v379_v34 }
 0x364   :  { %v1195_v36 = vpop.eup %1194 }
 0x365   :  { %761 = vst [vmem:[%s1624_s2 + $0x18] sm:$0xff] %v1195_v36  ;;  %1079 = vmatmul.mubr.f32.vlgmr.msra.gmra.mxu0 %v1195_v36 }
 0x366   :  { %1117 = vmatpush3.msra.mxu0 %v1225_v1  ;;  %1148 = vmatprep.mubr.msk.f32.mxu0 %vm1205_vm0, %v1204_v0 }
 0x367   :  { %1118 = vmatprep.subr.mxu0 %v1204_v0 }
 0x368   :  { %1119 = vmatpush3.msra.mxu0 %v1230_v2 }
 0x369   :  { %1120 = vmatprep.subr.mxu0 %v1204_v0 }
 0x36a   :  { %1121 = vmatpush3.msra.mxu0 %v1240_v3 }
 0x36b   :  { %1122 = vmatprep.subr.mxu0 %v1204_v0 }
 0x36c   :  { %1123 = vmatpush3.msra.mxu0 %v1249_v4 }
 0x36d   :  { %1124 = vmatprep.subr.mxu0 %v1204_v0 }
 0x36e   :  { %1125 = vmatpush3.msra.mxu0 %v1258_v5 }
 0x36f   :  { %1126 = vmatprep.subr.mxu0 %v1204_v0 }
 0x370   :  { %1127 = vmatpush3.msra.mxu0 %v1267_v6 }
 0x371   :  { %1128 = vmatprep.subr.mxu0 %v1204_v0 }
 0x372   :  { %1129 = vmatpush3.msra.mxu0 %v1276_v7 }
 0x373   :  { %1130 = vmatprep.subr.mxu0 %v1204_v0 }
 0x374   :  { %1131 = vmatpush3.msra.mxu0 %v1285_v8 }
 0x375   :  { %1132 = vmatprep.subr.mxu0 %v1204_v0 }
 0x376   :  { %1133 = vmatpush3.msra.mxu0 %v1294_v9 }
 0x377   :  { %1134 = vmatprep.subr.mxu0 %v1204_v0 }
 0x378   :  { %1135 = vmatpush3.msra.mxu0 %v1303_v10 }
 0x379   :  { %1136 = vmatprep.subr.mxu0 %v1204_v0 }
 0x37a   :  { %1137 = vmatpush3.msra.mxu0 %v1312_v11 }
 0x37b   :  { %1138 = vmatprep.subr.mxu0 %v1204_v0 }
 0x37c   :  { %1139 = vmatpush3.msra.mxu0 %v1321_v12 }
 0x37d   :  { %1140 = vmatprep.subr.mxu0 %v1204_v0 }
 0x37e   :  { %1141 = vmatpush3.msra.mxu0 %v1330_v13 }
 0x37f   :  { %1142 = vmatprep.subr.mxu0 %v1204_v0 }
 0x380   :  { %1143 = vmatpush3.msra.mxu0 %v1339_v14 }
 0x381   :  { %1144 = vmatprep.subr.mxu0 %v1204_v0 }
 0x382   :  { %1145 = vmatpush3.msra.mxu0 %v1348_v15 }
 0x383   :  { %1146 = vmatprep.subr.mxu0 %v1204_v0 }
 0x384   :  { %1147 = vmatpush3.msra.mxu0 %v1357_v16 }
 0x425   :  { %v467_v38 = vpop.f32.mrf.mxu0 }
 0x426   :  { %v471_v39 = vadd.f32 %v762_v37, %v467_v38 }
 0x427   :  { %v1080_v40 = vpop.f32.mrf.mxu0 }
 0x428   :  { %1196 = vtanh.f32 %v471_v39 }
 0x435   :  { %v1197_v41 = vpop.eup %1196 }
 0x436   :  { %763 = vst [vmem:[%s1624_s2 + $0x20] sm:$0xff] %v1197_v41  ;;  %1114 = vmatmul.mubr.f32.vlgmr.msra.gmra.mxu1 %v1197_v41 }
 0x437   :  { %1152 = vmatpush3.msra.mxu1 %v1225_v1  ;;  %1183 = vmatprep.mubr.msk.f32.mxu1 %vm1205_vm0, %v1204_v0 }
 0x438   :  { %1153 = vmatprep.subr.mxu1 %v1204_v0 }
 0x439   :  { %1154 = vmatpush3.msra.mxu1 %v1230_v2 }
 0x43a   :  { %1155 = vmatprep.subr.mxu1 %v1204_v0 }
 0x43b   :  { %1156 = vmatpush3.msra.mxu1 %v1240_v3 }
 0x43c   :  { %1157 = vmatprep.subr.mxu1 %v1204_v0 }
 0x43d   :  { %1158 = vmatpush3.msra.mxu1 %v1249_v4 }
 0x43e   :  { %1159 = vmatprep.subr.mxu1 %v1204_v0 }
 0x43f   :  { %1160 = vmatpush3.msra.mxu1 %v1258_v5 }
 0x440   :  { %1161 = vmatprep.subr.mxu1 %v1204_v0 }
 0x441   :  { %1162 = vmatpush3.msra.mxu1 %v1267_v6 }
 0x442   :  { %1163 = vmatprep.subr.mxu1 %v1204_v0 }
 0x443   :  { %1164 = vmatpush3.msra.mxu1 %v1276_v7 }
 0x444   :  { %1165 = vmatprep.subr.mxu1 %v1204_v0 }
 0x445   :  { %1166 = vmatpush3.msra.mxu1 %v1285_v8 }
 0x446   :  { %1167 = vmatprep.subr.mxu1 %v1204_v0 }
 0x447   :  { %1168 = vmatpush3.msra.mxu1 %v1294_v9 }
 0x448   :  { %1169 = vmatprep.subr.mxu1 %v1204_v0 }
 0x449   :  { %1170 = vmatpush3.msra.mxu1 %v1303_v10 }
 0x44a   :  { %1171 = vmatprep.subr.mxu1 %v1204_v0 }
 0x44b   :  { %1172 = vmatpush3.msra.mxu1 %v1312_v11 }
 0x44c   :  { %1173 = vmatprep.subr.mxu1 %v1204_v0 }
 0x44d   :  { %1174 = vmatpush3.msra.mxu1 %v1321_v12 }
 0x44e   :  { %1175 = vmatprep.subr.mxu1 %v1204_v0 }
 0x44f   :  { %1176 = vmatpush3.msra.mxu1 %v1330_v13 }
 0x450   :  { %1177 = vmatprep.subr.mxu1 %v1204_v0 }
 0x451   :  { %1178 = vmatpush3.msra.mxu1 %v1339_v14 }
 0x452   :  { %1179 = vmatprep.subr.mxu1 %v1204_v0 }
 0x453   :  { %1180 = vmatpush3.msra.mxu1 %v1348_v15 }
 0x454   :  { %1181 = vmatprep.subr.mxu1 %v1204_v0 }
 0x455   :  { %1182 = vmatpush3.msra.mxu1 %v1357_v16 }
 0x4f6   :  { %v559_v43 = vpop.f32.mrf.mxu1 }
 0x4f7   :  { %v563_v44 = vadd.f32 %v764_v42, %v559_v43 }
 0x4f8   :  { %v1115_v45 = vpop.f32.mrf.mxu1 }
 0x4f9   :  { %1198 = vtanh.f32 %v563_v44 }
 0x506   :  { %v1199_v46 = vpop.eup %1198 }
 0x507   :  { %765 = vst [vmem:[%s1624_s2 + $0x28] sm:$0xff] %v1199_v46  ;;  %1149 = vmatmul.mubr.f32.vlgmr.msra.gmra.mxu0 %v1199_v46 }
 0x5c7   :  { %v651_v48 = vpop.f32.mrf.mxu0 }
 0x5c8   :  { %v655_v49 = vadd.f32 %v766_v47, %v651_v48 }
 0x5c9   :  { %v1150_v50 = vpop.f32.mrf.mxu0 }
 0x5ca   :  { %1200 = vtanh.f32 %v655_v49 }
 0x5d7   :  { %v1201_v51 = vpop.eup %1200 }
 0x5d8   :  { %767 = vst [vmem:[%s1624_s2 + $0x30] sm:$0xff] %v1201_v51  ;;  %1184 = vmatmul.mubr.f32.vlgmr.msra.gmra.mxu1 %v1201_v51 }
 0x698   :  { %v743_v53 = vpop.f32.mrf.mxu1 }
 0x699   :  { %v747_v54 = vadd.f32 %v768_v52, %v743_v53 }
 0x69a   :  { %v1185_v55 = vpop.f32.mrf.mxu1 }
 0x69b   :  { %1202 = vtanh.f32 %v747_v54 }
 0x6a8   :  { %v1203_v56 = vpop.eup %1202 }
 0x6a9   :  { %769 = vst [vmem:[%s1624_s2 + $0x38] sm:$0xff] %v1203_v56 }

</bundles_post_ra>
